<compile_context>
chip_gen: v7x
topology: tpu7x:2x2x1
jax: 0.10.0
libtpu: 0.0.40
codegen_flags: <defaults>
</compile_context>

<pallas_src>
import functools

import jax
import jax.numpy as jnp
from jax.experimental import pallas as pl
from jax.experimental.pallas import tpu as pltpu


def _round_up(x, m):
    return (x + m - 1) // m * m


def _actor_critic_kernel(x_ref, p_ref, out_ref, *, s_pad, lanes, out_rows):
    """One batch tile: x (tb, s_pad) bf16 -> out (out_rows, tb) f32.

    Packed-parameter slab layout (bf16, lane width = `lanes`):
      rows [0, s_pad)                 : w1 (shared layer; b_sh folded into row S)
      rows [s_pad, s_pad+lanes)       : w2 = [w_a1 | w_c1]       (fused hidden layers)
      rows [s_pad+lanes, s_pad+2L)    : w3 block-diagonal heads  (mu lanes [:A], value lane A)
      rows [s_pad+2L, s_pad+2L+8)     : biases (row0 = [b_a1|b_c1], row1 = head biases)
    """
    o_w2 = s_pad
    o_w3 = s_pad + lanes
    o_b = s_pad + 2 * lanes

    x = x_ref[...]                                    # (tb, s_pad) bf16, col S == 1.0
    w1 = p_ref[pl.ds(0, s_pad), :]                    # (s_pad, lanes)
    w2 = p_ref[pl.ds(o_w2, lanes), :]                 # (lanes, lanes)
    w3 = p_ref[pl.ds(o_w3, lanes), :]                 # (lanes, lanes)
    biases = p_ref[pl.ds(o_b, 8), :]                  # (8, lanes)
    b2 = biases[0:1, :].astype(jnp.float32)
    b3 = biases[1:2, :].astype(jnp.float32)

    # shared layer; b_sh folded via the ones column of x. Padded lanes stay exactly 0.
    h = jnp.tanh(jnp.dot(x, w1, preferred_element_type=jnp.float32))
    # fused actor-l1 / critic-l1: hc = [tanh(h@w_a1+b_a1) | tanh(h@w_c1+b_c1)]
    hc = jnp.tanh(
        jnp.dot(h.astype(jnp.bfloat16), w2, preferred_element_type=jnp.float32) + b2)
    # fused block-diagonal heads: head[:, :A] = mu, head[:, A] = state_value
    head = jnp.dot(
        hc.astype(jnp.bfloat16), w3, preferred_element_type=jnp.float32) + b3
    # lane-dense output slab packed along the batch axis: (out_rows, tb).
    out_ref[...] = jnp.transpose(head[:, :out_rows]).astype(out_ref.dtype)


def actor_critic_forward(x, params, *, max_batch_tile=1024):
    """Fused ActorCritic forward on TPU. Returns ((mu, std), state_value)."""
    B, S = x.shape
    H = params["w_sh"].shape[1]
    A = params["w_a2"].shape[1]
    f32, bf16 = jnp.float32, jnp.bfloat16

    out_rows = 8                                       # mu rows [0,A), value row A, rest pad
    assert A + 1 <= out_rows, "heads must fit the 8-row output slab"
    s_pad = _round_up(S + 1, 8)                        # +1 column of ones for folded b_sh
    lanes = _round_up(max(2 * H, A + 1), 128)          # 128 for H=64
    assert 2 * H <= lanes and A + 1 <= lanes
    n_rows = s_pad + 2 * lanes + 8                     # packed-slab rows (multiple of 8)

    # ---- batch tiling: large tiles amortize per-step overhead; keep >=2 grid
    # steps for big batches so both v7x TensorCores get work.
    b_rounded = _round_up(max(B, 8), 8)
    if b_rounded <= 256:
        tb = b_rounded                                 # single step; block == full array
        b_pad = b_rounded
    else:
        tb = min(_round_up(max_batch_tile, 128),
                 _round_up(pl.cdiv(b_rounded, 2), 128))
        b_pad = _round_up(b_rounded, tb)

    # ---- pack all parameters into one lane-dense bf16 slab (single resident DMA)
    w1 = (jnp.zeros((s_pad, lanes), f32)
          .at[:S, :H].set(params["w_sh"].astype(f32))
          .at[S, :H].set(params["b_sh"].reshape(-1).astype(f32)))     # folded bias row
    w2 = (jnp.zeros((lanes, lanes), f32)
          .at[:H, :H].set(params["w_a1"].astype(f32))
          .at[:H, H:2 * H].set(params["w_c1"].astype(f32)))
    w3 = (jnp.zeros((lanes, lanes), f32)
          .at[:H, :A].set(params["w_a2"].astype(f32))
          .at[H:2 * H, A:A + 1].set(params["w_c2"].astype(f32)))
    bias = (jnp.zeros((8, lanes), f32)
            .at[0, :H].set(params["b_a1"].reshape(-1).astype(f32))
            .at[0, H:2 * H].set(params["b_c1"].reshape(-1).astype(f32))
            .at[1, :A].set(params["b_a2"].reshape(-1).astype(f32))
            .at[1, A:A + 1].set(params["b_c2"].reshape(-1).astype(f32)))
    packed = jnp.concatenate([w1, w2, w3, bias], axis=0).astype(bf16)

    # ---- pad x and append the ones column carrying the folded shared-layer bias
    x_pad = (jnp.zeros((b_pad, s_pad), bf16)
             .at[:B, :S].set(x.astype(bf16))
             .at[:, S].set(1.0))

    kernel = functools.partial(_actor_critic_kernel,
                               s_pad=s_pad, lanes=lanes, out_rows=out_rows)
    cost = pl.CostEstimate(
        flops=2 * b_pad * lanes * (s_pad + 2 * lanes),
        transcendentals=2 * b_pad * lanes,
        bytes_accessed=2 * (b_pad * s_pad + n_rows * lanes) + 4 * out_rows * b_pad,
    )

    out = pl.pallas_call(
        kernel,
        out_shape=jax.ShapeDtypeStruct((out_rows, b_pad), f32),
        grid_spec=pltpu.PrefetchScalarGridSpec(
            num_scalar_prefetch=0,
            grid=(b_pad // tb,),
            in_specs=[
                pl.BlockSpec((tb, s_pad), lambda i: (i, 0)),       # batch tile of x
                pl.BlockSpec((n_rows, lanes), lambda i: (0, 0)),   # resident param slab
            ],
            out_specs=pl.BlockSpec((out_rows, tb), lambda i: (0, i)),
        ),
        compiler_params=pltpu.CompilerParams(
            dimension_semantics=("parallel",)),
        cost_estimate=cost,
    )(x_pad, packed)

    mu = jnp.transpose(out[:A, :B])                    # (B, A)
    value = jnp.transpose(out[A:A + 1, :B])            # (B, 1)
    # std = exp(log_std) is batch-independent: computed once, broadcast here.
    std = jnp.broadcast_to(
        jnp.exp(params["log_std"].reshape(1, A).astype(f32)), (B, A))
    return (mu, std), value


def init_params(key, state_dim, action_dim, hidden_size=64):
    """Deterministic synthetic parameters (shapes match nn.Module __init__)."""
    ks = jax.random.split(key, 10)

    def lin(kw, kb, fan_in, fan_out):
        bound = 1.0 / jnp.sqrt(jnp.float32(fan_in))
        w = jax.random.uniform(kw, (fan_in, fan_out), jnp.float32, -bound, bound)
        b = jax.random.uniform(kb, (1, fan_out), jnp.float32, -bound, bound)
        return w, b

    w_sh, b_sh = lin(ks[0], ks[1], state_dim, hidden_size)
    w_a1, b_a1 = lin(ks[2], ks[3], hidden_size, hidden_size)
    w_a2, b_a2 = lin(ks[4], ks[5], hidden_size, action_dim)
    w_c1, b_c1 = lin(ks[6], ks[7], hidden_size, hidden_size)
    w_c2, b_c2 = lin(ks[8], ks[9], hidden_size, 1)
    log_std = jnp.zeros((1, action_dim), jnp.float32)

    return {
        "w_sh": w_sh, "b_sh": b_sh,
        "w_a1": w_a1, "b_a1": b_a1,
        "w_a2": w_a2, "b_a2": b_a2,
        "w_c1": w_c1, "b_c1": b_c1,
        "w_c2": w_c2, "b_c2": b_c2,
        "log_std": log_std,
    }


def reference_forward(x, p):
    """Pure-JAX f32 reference for correctness checking."""
    h = jnp.tanh(x @ p["w_sh"] + p["b_sh"])
    mu = jnp.tanh(h @ p["w_a1"] + p["b_a1"]) @ p["w_a2"] + p["b_a2"]
    std = jnp.broadcast_to(jnp.exp(p["log_std"]), mu.shape)
    val = jnp.tanh(h @ p["w_c1"] + p["b_c1"]) @ p["w_c2"] + p["b_c2"]
    return (mu, std), val


if __name__ == "__main__":
    # InvertedPendulum-v4: state_dim=4, action_dim=1; small batch of states.
    batch, state_dim, action_dim, hidden = 8, 4, 1, 64

    key = jax.random.PRNGKey(0)
    kx, kp = jax.random.split(key)
    x = jax.random.normal(kx, (batch, state_dim), jnp.float32)
    params = init_params(kp, state_dim, action_dim, hidden)

    (mu, std), value = actor_critic_forward(x, params)
    jax.block_until_ready((mu, std, value))

    (mu_ref, std_ref), val_ref = reference_forward(x, params)
    assert mu.shape == (batch, action_dim)
    assert std.shape == (batch, action_dim)
    assert value.shape == (batch, 1)
    # bf16 MXU operands with f32 accumulation -> bf16-class tolerance vs the
    # f32 reference (XLA's default f32 dot already rounds operands to bf16).
    assert jnp.allclose(mu, mu_ref, atol=1e-2, rtol=1e-2)
    assert jnp.allclose(std, std_ref, atol=1e-5)
    assert jnp.allclose(value, val_ref, atol=1e-2, rtol=1e-2)

    print("KERNEL_OK")
</pallas_src>

<mosaic_0001>
module attributes {stable_mosaic.version = 11 : i64} {
  func.func @_actor_critic_kernel(%arg0: i32, %arg1: memref<8x8xbf16, #tpu.memory_space<vmem>>, %arg2: memref<272x128xbf16, #tpu.memory_space<vmem>>, %arg3: memref<8x8xf32, #tpu.memory_space<vmem>>) attributes {dimension_semantics = [#tpu.dimension_semantics<parallel>], iteration_bounds = array<i64: 1>, scalar_prefetch = 0 : i64, scratch_operands = 0 : i64, tpu.core_type = #tpu.core_type<tc>, window_params = [{transform_indices = @transform_0, window_bounds = array<i64: 8, 8>}, {pipeline_mode = #tpu.pipeline_mode<synchronous>, transform_indices = @transform_1, window_bounds = array<i64: 272, 128>}, {transform_indices = @transform_2, window_bounds = array<i64: 8, 8>}]} {
    %c0 = arith.constant 0 : index
    %c0_0 = arith.constant 0 : index
    %0 = vector.load %arg1[%c0, %c0_0] : memref<8x8xbf16, #tpu.memory_space<vmem>>, vector<8x8xbf16>
    %c0_1 = arith.constant 0 : index
    %c0_2 = arith.constant 0 : index
    %1 = vector.load %arg2[%c0_1, %c0_2] : memref<272x128xbf16, #tpu.memory_space<vmem>>, vector<8x128xbf16>
    %c8 = arith.constant 8 : index
    %c0_3 = arith.constant 0 : index
    %2 = vector.load %arg2[%c8, %c0_3] : memref<272x128xbf16, #tpu.memory_space<vmem>>, vector<128x128xbf16>
    %c136 = arith.constant 136 : index
    %c0_4 = arith.constant 0 : index
    %3 = vector.load %arg2[%c136, %c0_4] : memref<272x128xbf16, #tpu.memory_space<vmem>>, vector<128x128xbf16>
    %c264 = arith.constant 264 : index
    %c0_5 = arith.constant 0 : index
    %4 = vector.load %arg2[%c264, %c0_5] : memref<272x128xbf16, #tpu.memory_space<vmem>>, vector<8x128xbf16>
    %5 = vector.extract_strided_slice %4 {offsets = [0, 0], sizes = [1, 128], strides = [1, 1]} : vector<8x128xbf16> to vector<1x128xbf16>
    %6 = arith.extf %5 : vector<1x128xbf16> to vector<1x128xf32>
    %7 = vector.extract_strided_slice %4 {offsets = [1, 0], sizes = [1, 128], strides = [1, 1]} : vector<8x128xbf16> to vector<1x128xbf16>
    %8 = arith.extf %7 : vector<1x128xbf16> to vector<1x128xf32>
    %cst = arith.constant dense<0.000000e+00> : vector<8x128xf32>
    %9 = tpu.matmul %0, %1, %cst {dimension_numbers = #tpu.dot_dimension_numbers<[1], [0], [0], [1], [0, 0, 1, 1], [], []>} : vector<8x8xbf16>, vector<8x128xbf16>, vector<8x128xf32> -> vector<8x128xf32>
    %10 = math.tanh %9 : vector<8x128xf32>
    %11 = arith.truncf %10 : vector<8x128xf32> to vector<8x128xbf16>
    %cst_6 = arith.constant dense<0.000000e+00> : vector<8x128xf32>
    %12 = tpu.matmul %11, %2, %cst_6 {dimension_numbers = #tpu.dot_dimension_numbers<[1], [0], [0], [1], [0, 0, 1, 1], [], []>} : vector<8x128xbf16>, vector<128x128xbf16>, vector<8x128xf32> -> vector<8x128xf32>
    %13 = vector.broadcast %6 : vector<1x128xf32> to vector<8x128xf32>
    %14 = arith.addf %12, %13 : vector<8x128xf32>
    %15 = math.tanh %14 : vector<8x128xf32>
    %16 = arith.truncf %15 : vector<8x128xf32> to vector<8x128xbf16>
    %cst_7 = arith.constant dense<0.000000e+00> : vector<8x128xf32>
    %17 = tpu.matmul %16, %3, %cst_7 {dimension_numbers = #tpu.dot_dimension_numbers<[1], [0], [0], [1], [0, 0, 1, 1], [], []>} : vector<8x128xbf16>, vector<128x128xbf16>, vector<8x128xf32> -> vector<8x128xf32>
    %18 = vector.broadcast %8 : vector<1x128xf32> to vector<8x128xf32>
    %19 = arith.addf %17, %18 : vector<8x128xf32>
    %20 = vector.extract_strided_slice %19 {offsets = [0, 0], sizes = [8, 8], strides = [1, 1]} : vector<8x128xf32> to vector<8x8xf32>
    %21 = tpu.transpose %20, [1, 0] : vector<8x8xf32> -> vector<8x8xf32>
    %c0_8 = arith.constant 0 : index
    %c0_9 = arith.constant 0 : index
    %22 = vector.load %arg3[%c0_8, %c0_9] : memref<8x8xf32, #tpu.memory_space<vmem>>, vector<8x8xf32>
    tpu.vector_store %arg3[%c0_8, %c0_9], %21 {strides = array<i32>} : memref<8x8xf32, #tpu.memory_space<vmem>>, vector<8x8xf32>,
    return
  }
  func.func @transform_0(%arg0: i32) -> (i32, i32) {
    %c0_i32 = arith.constant 0 : i32
    %c0_i32_0 = arith.constant 0 : i32
    return %arg0, %c0_i32 : i32, i32
  }
  func.func @transform_1(%arg0: i32) -> (i32, i32) {
    %c0_i32 = arith.constant 0 : i32
    %c0_i32_0 = arith.constant 0 : i32
    %c0_i32_1 = arith.constant 0 : i32
    return %c0_i32, %c0_i32_0 : i32, i32
  }
  func.func @transform_2(%arg0: i32) -> (i32, i32) {
    %c0_i32 = arith.constant 0 : i32
    %c0_i32_0 = arith.constant 0 : i32
    return %c0_i32, %arg0 : i32, i32
  }
}

</mosaic_0001>

<bundles_post_ra>
// kernel: tpu_custom_call.1
= control target key start
LH: loop header
LB: loop body
LE: loop exit
PB: predicated region body
PF: predicated region fallthrough
CT: control target
= control target key end

     0   :  { %7 = vsyncpa [#allocation3], 0  ;;  %s632_s0 = inlined_call_operand.hbm [shape: bf16[8,8], index: 0, kind: input, shape index: {}]   ;;  %s633_s1 = inlined_call_operand.hbm [shape: bf16[272,128], index: 1, kind: input, shape index: {}]   ;;  %s634_s2 = inlined_call_operand.hbm [shape: f32[8,8], index: 2, kind: output, shape index: {}]  }
   0x1   :  { %8 = vsyncpa [#allocation6], 0 }
   0x2   :  { %9 = vsyncpa [#allocation4], 0  ;;  %s542_s9 = smov [#allocation2]   ;;  %s543_s11 = smov [#allocation5]  }
   0x3   :  { %s16_s10 = sshll.u32 %s542_s9, 4  ;;  %s25_s12 = sshll.u32 %s543_s11, 4  ;;  %s17_s10 = int_to_ptr.vmem [resolvable:$true] %s16_s10  ;;  %s564_s12 = int_to_ptr.vmem [resolvable:$true] %s25_s12 }
   0x4   :  { %s470_s15 = scalar_lea.hbm %s632_s0, 64 }
   0x5   :  { %p471_p0 = scmp.ne.s32.totalorder %s632_s0, %s470_s15  ;;  %p474_p1 = scmp.lt.u32.totalorder %s470_s15, %s632_s0 }
   0x7   :  { %p476_p2 = pnand %p474_p1, %p471_p0 }
   0x9   :  { %479 = shalt.err (!%p476_p2)
}
   0xa   :  { %s480_s20 = scalar_lea.vmem %s17_s10, 64  ;;  %p485_p4 = scmp.lt.s32.totalorder %s17_s10, %s17_s10 }
   0xb   :  { %p481_p3 = scmp.ne.s32.totalorder %s17_s10, %s480_s20  ;;  %p486_p5 = scmp.lt.s32.totalorder %s480_s20, %s480_s20 }
   0xd   :  { %p487_p6 = por %p486_p5, %p485_p4 }
   0xf   :  { %p488_p7 = pnand %p487_p6, %p481_p3 }
  0x11   :  { %491 = shalt.err (!%p488_p7)
}
  0x12   :  { %19 = dma.hbm_to_vmem [thread:$0]  %s632_s0, 64, %s17_s10, [#allocation3]  }
  0x13   :  { %s492_s25 = scalar_lea.hbm %s633_s1, 2176 }
  0x14   :  { %p493_p8 = scmp.ne.s32.totalorder %s633_s1, %s492_s25  ;;  %p496_p9 = scmp.lt.u32.totalorder %s492_s25, %s633_s1 }
  0x16   :  { %p498_p10 = pnand %p496_p9, %p493_p8 }
  0x18   :  { %501 = shalt.err (!%p498_p10)
}
  0x19   :  { %s502_s30 = scalar_lea.vmem %s564_s12, 2176  ;;  %p507_p12 = scmp.lt.s32.totalorder %s564_s12, %s564_s12 }
  0x1a   :  { %p503_p11 = scmp.ne.s32.totalorder %s564_s12, %s502_s30  ;;  %p508_p13 = scmp.lt.s32.totalorder %s502_s30, %s502_s30 }
  0x1c   :  { %p509_p0 = por %p508_p13, %p507_p12 }
  0x1e   :  { %p510_p1 = pnand %p509_p0, %p503_p11 }
  0x20   :  { %513 = shalt.err (!%p510_p1)
}
  0x21   :  { %s544_s0 = smov 64   ;;  %s545_s3 = smov 4  }
  0x22   :  { %31 = dma.hbm_to_vmem [thread:$0]  %s633_s1, 2176, %s564_s12, [#allocation6], %s544_s0, %s544_s0, %s545_s3  }
  0x23   :  { %536 = dma.done.wait [#allocation3], 64  }
  0x24   :  { %537 = vsyncadd [#allocation3], 4294967232 }
  0x25   :  { %538 = dma.done.wait [#allocation6], 2176  }
  0x26   :  { %539 = vsyncadd [#allocation6], 4294965120  ;;  %v546_v0 = vmov 0.0   ;;  %vm547_vm0 = vmmov 0   ;;  %vm79_vm1 = vcmask 1043456   ;;  %vm75_vm2 = vcmask 64512  }
  0x27   :  { %397 = vmatprep.subr.bf16.mxu0 %v546_v0  ;;  %399 = vmatprep.mubr.msk.bf16.mxu0 %vm547_vm0, %v546_v0  ;;  %v40_v1 = vld [vmem:[#allocation5] sm:$0xf]  ;;  %v450_v3 = vld [vmem:[#allocation5 + $0x4] sm:$0xff]   ;;  %v39_v4 = vld [vmem:[#allocation2] sm:$0xf]  ;;  %v125_v26 = vlaneseq  ;;  %s548_s1 = smov [#allocation7]  }
  0x28   :  { %403 = vmatprep.subr.bf16.mxu1 %v546_v0  ;;  %419 = vmatprep.mubr.msk.bf16.mxu1 %vm547_vm0, %v546_v0  ;;  %v81_v2 = vsel %vm79_vm1, %v40_v1, 0  ;;  %v451_v5 = vld [vmem:[#allocation5 + $0xc] sm:$0xff]   ;;  %v452_v6 = vld [vmem:[#allocation5 + $0x14] sm:$0xff]   ;;  %v453_v7 = vld [vmem:[#allocation5 + $0x1c] sm:$0xff]   ;;  %s350_s6 = sshll.u32 %s548_s1, 4  ;;  %s351_s6 = int_to_ptr.vmem [resolvable:$true] %s350_s6 }
  0x29   :  { %398 = vmatpush3.bf16.msra.mxu0 %v81_v2  ;;  %404 = vmatpush3.bf16.msra.mxu1 %v450_v3  ;;  %v454_v8 = vld [vmem:[#allocation5 + $0x24] sm:$0xff]   ;;  %v455_v9 = vld [vmem:[#allocation5 + $0x2c] sm:$0xff]   ;;  %v456_v10 = vld [vmem:[#allocation5 + $0x34] sm:$0xff]   ;;  %v126_v27 = vshrl.u32 %v125_v26, 7  ;;  %s514_s7 = scalar_lea.vmem %s351_s6, 128  ;;  %p519_p3 = scmp.lt.s32.totalorder %s351_s6, %s351_s6 }
  0x2a   :  { %423 = vmatprep.subr.bf16.mxu0 %v546_v0  ;;  %405 = vmatprep.subr.bf16.mxu1 %v546_v0  ;;  %v457_v11 = vld [vmem:[#allocation5 + $0x3c] sm:$0xff]   ;;  %v458_v12 = vld [vmem:[#allocation5 + $0x44] sm:$0xff]   ;;  %v459_v13 = vld [vmem:[#allocation5 + $0x4c] sm:$0xff]   ;;  %p515_p2 = scmp.ne.s32.totalorder %s351_s6, %s514_s7  ;;  %p520_p4 = scmp.lt.s32.totalorder %s514_s7, %s514_s7 }
  0x2b   :  { %v460_v14 = vld [vmem:[#allocation5 + $0x54] sm:$0xff]   ;;  %v461_v15 = vld [vmem:[#allocation5 + $0x5c] sm:$0xff]   ;;  %v462_v22 = vld [vmem:[#allocation5 + $0x64] sm:$0xff]   ;;  %v127_v30 = vsub.s32 0, %v126_v27  ;;  %v221_v39 = vsub.s32 1, %v126_v27 }
  0x2c   :  { %400 = vmatmul.mubr.msk.bf16.vlgmr.msra.gmra.mrb[0].mxu0 %vm75_vm2, %v39_v4  ;;  %v463_v23 = vld [vmem:[#allocation5 + $0x6c] sm:$0xff]   ;;  %v464_v24 = vld [vmem:[#allocation5 + $0x74] sm:$0xff]   ;;  %v465_v25 = vld [vmem:[#allocation5 + $0x7c] sm:$0xff]   ;;  %p521_p5 = por %p520_p4, %p519_p3 }
  0x2d   :  { %439 = vmatprep.mubr.msk.bf16.mxu0 %vm547_vm0, %v546_v0  ;;  %406 = vmatpush3.bf16.msra.mxu1 %v451_v5  ;;  %v73_v28 = vld [vmem:[#allocation5 + $0x84] sm:$0xf] }
  0x2e   :  { %407 = vmatprep.subr.bf16.mxu1 %v546_v0  ;;  %424 = vmatpush3.bf16.msra.mxu0 %v458_v12  ;;  %v74_v29 = vunpack.c.l.bf16 %v73_v28  ;;  %p522_p6 = pnand %p521_p5, %p515_p2 }
  0x2f   :  { %425 = vmatprep.subr.bf16.mxu0 %v546_v0 }
  0x30   :  { %v128_v31 = vrot.slane %v74_v29, %v127_v30  ;;  %v222_v40 = vrot.slane %v74_v29, %v221_v39 }
  0x31   :  { %408 = vmatpush3.bf16.msra.mxu1 %v452_v6 }
  0x32   :  { %409 = vmatprep.subr.bf16.mxu1 %v546_v0  ;;  %426 = vmatpush3.bf16.msra.mxu0 %v459_v13 }
  0x33   :  { %427 = vmatprep.subr.bf16.mxu0 %v546_v0 }
  0x35   :  { %410 = vmatpush3.bf16.msra.mxu1 %v453_v7 }
  0x36   :  { %411 = vmatprep.subr.bf16.mxu1 %v546_v0  ;;  %428 = vmatpush3.bf16.msra.mxu0 %v460_v14 }
  0x37   :  { %429 = vmatprep.subr.bf16.mxu0 %v546_v0 }
  0x39   :  { %412 = vmatpush3.bf16.msra.mxu1 %v454_v8 }
  0x3a   :  { %413 = vmatprep.subr.bf16.mxu1 %v546_v0  ;;  %430 = vmatpush3.bf16.msra.mxu0 %v461_v15 }
  0x3b   :  { %431 = vmatprep.subr.bf16.mxu0 %v546_v0 }
  0x3d   :  { %414 = vmatpush3.bf16.msra.mxu1 %v455_v9 }
  0x3e   :  { %415 = vmatprep.subr.bf16.mxu1 %v546_v0  ;;  %432 = vmatpush3.bf16.msra.mxu0 %v462_v22 }
  0x3f   :  { %433 = vmatprep.subr.bf16.mxu0 %v546_v0 }
  0x41   :  { %416 = vmatpush3.bf16.msra.mxu1 %v456_v10 }
  0x42   :  { %417 = vmatprep.subr.bf16.mxu1 %v546_v0  ;;  %434 = vmatpush3.bf16.msra.mxu0 %v463_v23 }
  0x43   :  { %435 = vmatprep.subr.bf16.mxu0 %v546_v0 }
  0x45   :  { %418 = vmatpush3.bf16.msra.mxu1 %v457_v11 }
  0x46   :  { %436 = vmatpush3.bf16.msra.mxu0 %v464_v24 }
  0x47   :  { %437 = vmatprep.subr.bf16.mxu0 %v546_v0 }
  0x4a   :  { %438 = vmatpush3.bf16.msra.mxu0 %v465_v25 }
  0xff   :  { %v117_v16 = vpop.f32.mrb[0].mxu0 }
 0x100   :  { %466 = vtanh.f32 %v117_v16  ;;  %v401_v17 = vpop.f32.mrb[1].mxu0 }
 0x101   :  { %v120_v18 = vpop.f32.mrb[2].mxu0 }
 0x102   :  { %v402_v19 = vpop.f32.mrb[3].mxu0 }
 0x10a   :  { %v467_v20 = vpop.eup %466 }
 0x10b   :  { %v124_v21 = vpack.c.bf16 %v467_v20, %v467_v20 }
 0x10d   :  { %420 = vmatmul.mubr.bf16.vlgmr.msra.gmra.mrb[0].mxu1 %v124_v21 }
 0x1e0   :  { %v211_v32 = vpop.f32.mrb[0].mxu1 }
 0x1e1   :  { %v212_v33 = vadd.f32 %v211_v32, %v128_v31  ;;  %v421_v34 = vpop.f32.mrb[1].mxu1 }
 0x1e2   :  { %v214_v35 = vpop.f32.mrb[2].mxu1 }
 0x1e3   :  { %468 = vtanh.f32 %v212_v33  ;;  %v422_v36 = vpop.f32.mrb[3].mxu1 }
 0x1ed   :  { %v469_v37 = vpop.eup %468 }
 0x1ee   :  { %v218_v38 = vpack.c.bf16 %v469_v37, %v469_v37 }
 0x1f0   :  { %440 = vmatmul.mubr.bf16.vlgmr.msra.gmra.mrb[4].mxu0 %v218_v38 }
 0x2c3   :  { %v305_v41 = vpop.f32.mrb[4].mxu0 }
 0x2c4   :  { %v441_v42 = vpop.f32.mrb[5].mxu0  ;;  %v306_v43 = vadd.f32 %v305_v41, %v222_v40 }
 0x2c5   :  { %v308_v44 = vpop.f32.mrb[6].mxu0 }
 0x2c6   :  { %311 = vxpose.xlu0.b32.start.end [1/1] (short) (narrow) %v306_v43, 8  ;;  %v442_v45 = vpop.f32.mrb[7].mxu0 }
 0x346   :  { %v327_v46 = vpop.trf.xlu0 }
 0x347   :  { %343 = vst.msk [vmem:[#allocation7] sm:$0xff] %vm75_vm2, %v327_v46 }
 0x348   :  { %525 = shalt.err (!%p522_p6)
}
 0x349   :  { %s526_s10 = scalar_lea.hbm %s634_s2, 128 }
 0x34a   :  { %p527_p7 = scmp.ne.s32.totalorder %s634_s2, %s526_s10  ;;  %p530_p8 = scmp.lt.u32.totalorder %s526_s10, %s634_s2 }
 0x34c   :  { %p532_p9 = pnand %p530_p8, %p527_p7 }
 0x34e   :  { %535 = shalt.err (!%p532_p9)
}
 0x34f   :  { %353 = dma.vmem_to_hbm [thread:$0]  %s351_s6, 128, %s634_s2, [#allocation4]  }
 0x350   :  { %540 = dma.done.wait [#allocation4], 128  }
 0x351   :  { %541 = vsyncadd [#allocation4], 4294967168 }
 0x352   :  { %357 = vsyncpa [#allocation3], 1 }
 0x353   :  { %358 = vsyncpa [#allocation6], 1 }
 0x354   :  { %359 = vsyncpa [#allocation4], 1 }

</bundles_post_ra>
